<compile_context>
chip_gen: v7x
topology: tpu7x:2x2x1
jax: 0.10.0
libtpu: 0.0.40
codegen_flags: <defaults>
</compile_context>

<pallas_src>
import jax
import jax.numpy as jnp
import numpy as np
from jax import lax
from jax.experimental import pallas as pl
from jax.experimental.pallas import tpu as pltpu

# Problem sizes (module: nin=4, nout=8, k=3, s=1, p=0)
B, CIN, H, W = 2, 4, 16, 16
COUT = 8
KH = KW = 3
HO, WO = H - KH + 1, W - KW + 1           # 14 x 14 VALID output

HW = H * W                                # 256 spatial positions on the lane axis
CP = 8                                    # CIN padded to a full sublane tile
KK = KH * KW                              # 9 taps
KTOT = KK * CP                            # 72 real contraction rows (tap-major, chan-minor)
KPAD = 80                                 # + 1 bias row + 7 pad rows (sublane aligned)
LOUT = HW                                 # 256 lanes per batch element
NLANES = B * LOUT                         # 512-lane merged-batch matmul / store width
LPAD = 384                                # padded spatial length so every tap window fits
SHIFTS = tuple(ki * W + kj for ki in range(KH) for kj in range(KW))   # 0 .. 34


def dsc_kernel(x_ref, w_ref, o_ref, p_ref):
    # x_ref : (B, CP, LPAD)      NCHW-native input, spatial flattened onto lanes
    # w_ref : (COUT, KPAD)       composite weights + bias column (72) + zero cols
    # o_ref : (COUT, B*LOUT)     lane-dense merged-batch output
    # p_ref : (KPAD, B*LOUT)     VMEM scratch holding the im2col patch slab
    #
    # im2col straight into VMEM scratch: sublane-/lane-aligned (CP, LOUT) stores.
    for b in range(B):
        xb = x_ref[b]                                        # (CP, LPAD)
        for t, sh in enumerate(SHIFTS):
            p_ref[t * CP:(t + 1) * CP, b * LOUT:(b + 1) * LOUT] = xb[:, sh:sh + LOUT]
    # Bias / padding rows: ones.  Weight column 72 carries the bias, 73..79 are 0.
    p_ref[KTOT:KPAD, :] = jnp.ones((KPAD - KTOT, NLANES), jnp.float32)
    # One MXU contraction for both batch elements, bias fused into K.
    out = jnp.dot(w_ref[...], p_ref[...], preferred_element_type=jnp.float32)
    o_ref[...] = out.astype(o_ref.dtype)                     # single (8, 512) store


def _depthwise_separable_conv(x_nchw, dw_w, dw_b, pw_w, pw_b):
    """x_nchw: (B, CIN, H, W); dw_w: (CIN,1,KH,KW); dw_b: (CIN,);
    pw_w: (COUT, CIN, 1, 1); pw_b: (COUT,). Returns (B, COUT, HO, WO)."""
    dtype = x_nchw.dtype

    # NCHW-native prep: flatten spatial, pad channels -> CP and spatial -> LPAD.
    x_flat = x_nchw.reshape(B, CIN, HW)
    x_pad = jnp.pad(x_flat, ((0, 0), (0, CP - CIN), (0, LPAD - HW)))

    # Fuse depthwise + pointwise into one composite contraction.
    pw2d = pw_w.reshape(COUT, CIN)                              # (COUT, CIN)
    w_comp = pw2d[:, :, None, None] * dw_w[:, 0][None]          # (COUT, CIN, KH, KW)
    w_comp = jnp.pad(w_comp, ((0, 0), (0, CP - CIN), (0, 0), (0, 0)))
    # tap-major / channel-minor flattening matches the in-kernel patch order.
    w_taps = jnp.transpose(w_comp, (0, 2, 3, 1)).reshape(COUT, KTOT)
    b_comp = (pw_b + pw2d @ dw_b).reshape(COUT, 1)
    # Append bias column (index KTOT), then zero-pad K to KPAD.
    w_flat = jnp.concatenate(
        [w_taps, b_comp, jnp.zeros((COUT, KPAD - KTOT - 1), w_taps.dtype)], axis=1)

    out_full = pl.pallas_call(
        dsc_kernel,
        out_shape=jax.ShapeDtypeStruct((COUT, NLANES), jnp.float32),
        grid=(1,),
        in_specs=[
            pl.BlockSpec((B, CP, LPAD), lambda i: (0, 0, 0)),
            pl.BlockSpec((COUT, KPAD), lambda i: (0, 0)),
        ],
        out_specs=pl.BlockSpec((COUT, NLANES), lambda i: (0, 0)),
        scratch_shapes=[pltpu.VMEM((KPAD, NLANES), jnp.float32)],
        compiler_params=pltpu.CompilerParams(
            dimension_semantics=("arbitrary",)),
        cost_estimate=pl.CostEstimate(
            flops=2 * COUT * KPAD * NLANES,
            transcendentals=0,
            bytes_accessed=4 * (B * CP * LPAD + COUT * KPAD + COUT * NLANES)),
    )(x_pad.astype(jnp.float32), w_flat.astype(jnp.float32))

    # (COUT, B*LOUT) -> (B, COUT, H, W); keep only the valid VALID-conv window.
    out = out_full.reshape(COUT, B, H, W).transpose(1, 0, 2, 3)[:, :, :HO, :WO]
    return out.astype(dtype)


depthwise_separable_conv = jax.jit(_depthwise_separable_conv)


def reference(x, dw_w, dw_b, pw_w, pw_b):
    dn = ("NCHW", "OIHW", "NCHW")
    dw = lax.conv_general_dilated(x, dw_w, (1, 1), "VALID",
                                  feature_group_count=CIN,
                                  dimension_numbers=dn)
    dw = dw + dw_b.reshape(1, CIN, 1, 1)
    pw = lax.conv_general_dilated(dw, pw_w, (1, 1), "VALID",
                                  dimension_numbers=dn)
    return pw + pw_b.reshape(1, COUT, 1, 1)


if __name__ == "__main__":
    key = jax.random.PRNGKey(0)
    kx, k1, k2, k3, k4 = jax.random.split(key, 5)

    x = jax.random.normal(kx, (B, CIN, H, W), jnp.float32)

    # Deterministic parameter init (PyTorch Conv2d-style uniform bounds).
    fan_dw = 1 * KH * KW
    bound_dw = 1.0 / np.sqrt(fan_dw)
    dw_w = jax.random.uniform(k1, (CIN, 1, KH, KW), jnp.float32,
                              -bound_dw, bound_dw)
    dw_b = jax.random.uniform(k2, (CIN,), jnp.float32, -bound_dw, bound_dw)

    fan_pw = CIN * 1 * 1
    bound_pw = 1.0 / np.sqrt(fan_pw)
    pw_w = jax.random.uniform(k3, (COUT, CIN, 1, 1), jnp.float32,
                              -bound_pw, bound_pw)
    pw_b = jax.random.uniform(k4, (COUT,), jnp.float32, -bound_pw, bound_pw)

    out = depthwise_separable_conv(x, dw_w, dw_b, pw_w, pw_b)
    out = jax.block_until_ready(out)

    ref = reference(x, dw_w, dw_b, pw_w, pw_b)
    np.testing.assert_allclose(np.asarray(out), np.asarray(ref),
                               rtol=1e-5, atol=1e-5)
    assert out.shape == (B, COUT, HO, WO)

    print("KERNEL_OK")
</pallas_src>

<mosaic_0001>
module attributes {stable_mosaic.version = 11 : i64} {
  func.func @dsc_kernel(%arg0: i32, %arg1: memref<2x8x384xf32, #tpu.memory_space<vmem>>, %arg2: memref<8x80xf32, #tpu.memory_space<vmem>>, %arg3: memref<8x512xf32, #tpu.memory_space<vmem>>, %arg4: memref<80x512xf32, #tpu.memory_space<vmem>>) attributes {dimension_semantics = [#tpu.dimension_semantics<arbitrary>], iteration_bounds = array<i64: 1>, scalar_prefetch = 0 : i64, scratch_operands = 1 : i64, tpu.core_type = #tpu.core_type<tc>, window_params = [{pipeline_mode = #tpu.pipeline_mode<synchronous>, transform_indices = @transform_0, window_bounds = array<i64: 2, 8, 384>}, {pipeline_mode = #tpu.pipeline_mode<synchronous>, transform_indices = @transform_1, window_bounds = array<i64: 8, 80>}, {pipeline_mode = #tpu.pipeline_mode<synchronous>, transform_indices = @transform_2, window_bounds = array<i64: 8, 512>}]} {
    %c0 = arith.constant 0 : index
    %c0_0 = arith.constant 0 : index
    %c0_1 = arith.constant 0 : index
    %0 = vector.load %arg1[%c0, %c0_0, %c0_1] : memref<2x8x384xf32, #tpu.memory_space<vmem>>, vector<1x8x384xf32>
    %1 = vector.shape_cast %0 : vector<1x8x384xf32> to vector<8x384xf32>
    %2 = vector.extract_strided_slice %1 {offsets = [0, 0], sizes = [8, 256], strides = [1, 1]} : vector<8x384xf32> to vector<8x256xf32>
    %c0_2 = arith.constant 0 : index
    %c0_3 = arith.constant 0 : index
    %3 = vector.load %arg4[%c0_2, %c0_3] : memref<80x512xf32, #tpu.memory_space<vmem>>, vector<8x256xf32>
    tpu.vector_store %arg4[%c0_2, %c0_3], %2 {strides = array<i32>} : memref<80x512xf32, #tpu.memory_space<vmem>>, vector<8x256xf32>,
    %4 = vector.extract_strided_slice %1 {offsets = [0, 1], sizes = [8, 256], strides = [1, 1]} : vector<8x384xf32> to vector<8x256xf32>
    %c8 = arith.constant 8 : index
    %c0_4 = arith.constant 0 : index
    %5 = vector.load %arg4[%c8, %c0_4] : memref<80x512xf32, #tpu.memory_space<vmem>>, vector<8x256xf32>
    tpu.vector_store %arg4[%c8, %c0_4], %4 {strides = array<i32>} : memref<80x512xf32, #tpu.memory_space<vmem>>, vector<8x256xf32>,
    %6 = vector.extract_strided_slice %1 {offsets = [0, 2], sizes = [8, 256], strides = [1, 1]} : vector<8x384xf32> to vector<8x256xf32>
    %c16 = arith.constant 16 : index
    %c0_5 = arith.constant 0 : index
    %7 = vector.load %arg4[%c16, %c0_5] : memref<80x512xf32, #tpu.memory_space<vmem>>, vector<8x256xf32>
    tpu.vector_store %arg4[%c16, %c0_5], %6 {strides = array<i32>} : memref<80x512xf32, #tpu.memory_space<vmem>>, vector<8x256xf32>,
    %8 = vector.extract_strided_slice %1 {offsets = [0, 16], sizes = [8, 256], strides = [1, 1]} : vector<8x384xf32> to vector<8x256xf32>
    %c24 = arith.constant 24 : index
    %c0_6 = arith.constant 0 : index
    %9 = vector.load %arg4[%c24, %c0_6] : memref<80x512xf32, #tpu.memory_space<vmem>>, vector<8x256xf32>
    tpu.vector_store %arg4[%c24, %c0_6], %8 {strides = array<i32>} : memref<80x512xf32, #tpu.memory_space<vmem>>, vector<8x256xf32>,
    %10 = vector.extract_strided_slice %1 {offsets = [0, 17], sizes = [8, 256], strides = [1, 1]} : vector<8x384xf32> to vector<8x256xf32>
    %c32 = arith.constant 32 : index
    %c0_7 = arith.constant 0 : index
    %11 = vector.load %arg4[%c32, %c0_7] : memref<80x512xf32, #tpu.memory_space<vmem>>, vector<8x256xf32>
    tpu.vector_store %arg4[%c32, %c0_7], %10 {strides = array<i32>} : memref<80x512xf32, #tpu.memory_space<vmem>>, vector<8x256xf32>,
    %12 = vector.extract_strided_slice %1 {offsets = [0, 18], sizes = [8, 256], strides = [1, 1]} : vector<8x384xf32> to vector<8x256xf32>
    %c40 = arith.constant 40 : index
    %c0_8 = arith.constant 0 : index
    %13 = vector.load %arg4[%c40, %c0_8] : memref<80x512xf32, #tpu.memory_space<vmem>>, vector<8x256xf32>
    tpu.vector_store %arg4[%c40, %c0_8], %12 {strides = array<i32>} : memref<80x512xf32, #tpu.memory_space<vmem>>, vector<8x256xf32>,
    %14 = vector.extract_strided_slice %1 {offsets = [0, 32], sizes = [8, 256], strides = [1, 1]} : vector<8x384xf32> to vector<8x256xf32>
    %c48 = arith.constant 48 : index
    %c0_9 = arith.constant 0 : index
    %15 = vector.load %arg4[%c48, %c0_9] : memref<80x512xf32, #tpu.memory_space<vmem>>, vector<8x256xf32>
    tpu.vector_store %arg4[%c48, %c0_9], %14 {strides = array<i32>} : memref<80x512xf32, #tpu.memory_space<vmem>>, vector<8x256xf32>,
    %16 = vector.extract_strided_slice %1 {offsets = [0, 33], sizes = [8, 256], strides = [1, 1]} : vector<8x384xf32> to vector<8x256xf32>
    %c56 = arith.constant 56 : index
    %c0_10 = arith.constant 0 : index
    %17 = vector.load %arg4[%c56, %c0_10] : memref<80x512xf32, #tpu.memory_space<vmem>>, vector<8x256xf32>
    tpu.vector_store %arg4[%c56, %c0_10], %16 {strides = array<i32>} : memref<80x512xf32, #tpu.memory_space<vmem>>, vector<8x256xf32>,
    %18 = vector.extract_strided_slice %1 {offsets = [0, 34], sizes = [8, 256], strides = [1, 1]} : vector<8x384xf32> to vector<8x256xf32>
    %c64 = arith.constant 64 : index
    %c0_11 = arith.constant 0 : index
    %19 = vector.load %arg4[%c64, %c0_11] : memref<80x512xf32, #tpu.memory_space<vmem>>, vector<8x256xf32>
    tpu.vector_store %arg4[%c64, %c0_11], %18 {strides = array<i32>} : memref<80x512xf32, #tpu.memory_space<vmem>>, vector<8x256xf32>,
    %c1 = arith.constant 1 : index
    %c0_12 = arith.constant 0 : index
    %c0_13 = arith.constant 0 : index
    %20 = vector.load %arg1[%c1, %c0_12, %c0_13] : memref<2x8x384xf32, #tpu.memory_space<vmem>>, vector<1x8x384xf32>
    %21 = vector.shape_cast %20 : vector<1x8x384xf32> to vector<8x384xf32>
    %22 = vector.extract_strided_slice %21 {offsets = [0, 0], sizes = [8, 256], strides = [1, 1]} : vector<8x384xf32> to vector<8x256xf32>
    %c0_14 = arith.constant 0 : index
    %c256 = arith.constant 256 : index
    %23 = vector.load %arg4[%c0_14, %c256] : memref<80x512xf32, #tpu.memory_space<vmem>>, vector<8x256xf32>
    tpu.vector_store %arg4[%c0_14, %c256], %22 {strides = array<i32>} : memref<80x512xf32, #tpu.memory_space<vmem>>, vector<8x256xf32>,
    %24 = vector.extract_strided_slice %21 {offsets = [0, 1], sizes = [8, 256], strides = [1, 1]} : vector<8x384xf32> to vector<8x256xf32>
    %c8_15 = arith.constant 8 : index
    %c256_16 = arith.constant 256 : index
    %25 = vector.load %arg4[%c8_15, %c256_16] : memref<80x512xf32, #tpu.memory_space<vmem>>, vector<8x256xf32>
    tpu.vector_store %arg4[%c8_15, %c256_16], %24 {strides = array<i32>} : memref<80x512xf32, #tpu.memory_space<vmem>>, vector<8x256xf32>,
    %26 = vector.extract_strided_slice %21 {offsets = [0, 2], sizes = [8, 256], strides = [1, 1]} : vector<8x384xf32> to vector<8x256xf32>
    %c16_17 = arith.constant 16 : index
    %c256_18 = arith.constant 256 : index
    %27 = vector.load %arg4[%c16_17, %c256_18] : memref<80x512xf32, #tpu.memory_space<vmem>>, vector<8x256xf32>
    tpu.vector_store %arg4[%c16_17, %c256_18], %26 {strides = array<i32>} : memref<80x512xf32, #tpu.memory_space<vmem>>, vector<8x256xf32>,
    %28 = vector.extract_strided_slice %21 {offsets = [0, 16], sizes = [8, 256], strides = [1, 1]} : vector<8x384xf32> to vector<8x256xf32>
    %c24_19 = arith.constant 24 : index
    %c256_20 = arith.constant 256 : index
    %29 = vector.load %arg4[%c24_19, %c256_20] : memref<80x512xf32, #tpu.memory_space<vmem>>, vector<8x256xf32>
    tpu.vector_store %arg4[%c24_19, %c256_20], %28 {strides = array<i32>} : memref<80x512xf32, #tpu.memory_space<vmem>>, vector<8x256xf32>,
    %30 = vector.extract_strided_slice %21 {offsets = [0, 17], sizes = [8, 256], strides = [1, 1]} : vector<8x384xf32> to vector<8x256xf32>
    %c32_21 = arith.constant 32 : index
    %c256_22 = arith.constant 256 : index
    %31 = vector.load %arg4[%c32_21, %c256_22] : memref<80x512xf32, #tpu.memory_space<vmem>>, vector<8x256xf32>
    tpu.vector_store %arg4[%c32_21, %c256_22], %30 {strides = array<i32>} : memref<80x512xf32, #tpu.memory_space<vmem>>, vector<8x256xf32>,
    %32 = vector.extract_strided_slice %21 {offsets = [0, 18], sizes = [8, 256], strides = [1, 1]} : vector<8x384xf32> to vector<8x256xf32>
    %c40_23 = arith.constant 40 : index
    %c256_24 = arith.constant 256 : index
    %33 = vector.load %arg4[%c40_23, %c256_24] : memref<80x512xf32, #tpu.memory_space<vmem>>, vector<8x256xf32>
    tpu.vector_store %arg4[%c40_23, %c256_24], %32 {strides = array<i32>} : memref<80x512xf32, #tpu.memory_space<vmem>>, vector<8x256xf32>,
    %34 = vector.extract_strided_slice %21 {offsets = [0, 32], sizes = [8, 256], strides = [1, 1]} : vector<8x384xf32> to vector<8x256xf32>
    %c48_25 = arith.constant 48 : index
    %c256_26 = arith.constant 256 : index
    %35 = vector.load %arg4[%c48_25, %c256_26] : memref<80x512xf32, #tpu.memory_space<vmem>>, vector<8x256xf32>
    tpu.vector_store %arg4[%c48_25, %c256_26], %34 {strides = array<i32>} : memref<80x512xf32, #tpu.memory_space<vmem>>, vector<8x256xf32>,
    %36 = vector.extract_strided_slice %21 {offsets = [0, 33], sizes = [8, 256], strides = [1, 1]} : vector<8x384xf32> to vector<8x256xf32>
    %c56_27 = arith.constant 56 : index
    %c256_28 = arith.constant 256 : index
    %37 = vector.load %arg4[%c56_27, %c256_28] : memref<80x512xf32, #tpu.memory_space<vmem>>, vector<8x256xf32>
    tpu.vector_store %arg4[%c56_27, %c256_28], %36 {strides = array<i32>} : memref<80x512xf32, #tpu.memory_space<vmem>>, vector<8x256xf32>,
    %38 = vector.extract_strided_slice %21 {offsets = [0, 34], sizes = [8, 256], strides = [1, 1]} : vector<8x384xf32> to vector<8x256xf32>
    %c64_29 = arith.constant 64 : index
    %c256_30 = arith.constant 256 : index
    %39 = vector.load %arg4[%c64_29, %c256_30] : memref<80x512xf32, #tpu.memory_space<vmem>>, vector<8x256xf32>
    tpu.vector_store %arg4[%c64_29, %c256_30], %38 {strides = array<i32>} : memref<80x512xf32, #tpu.memory_space<vmem>>, vector<8x256xf32>,
    %cst = arith.constant 1.000000e+00 : f32
    %40 = vector.broadcast %cst : f32 to vector<8x512xf32>
    %c72 = arith.constant 72 : index
    %c0_31 = arith.constant 0 : index
    %41 = vector.load %arg4[%c72, %c0_31] : memref<80x512xf32, #tpu.memory_space<vmem>>, vector<8x512xf32>
    tpu.vector_store %arg4[%c72, %c0_31], %40 {strides = array<i32>} : memref<80x512xf32, #tpu.memory_space<vmem>>, vector<8x512xf32>,
    %c0_32 = arith.constant 0 : index
    %c0_33 = arith.constant 0 : index
    %42 = vector.load %arg2[%c0_32, %c0_33] : memref<8x80xf32, #tpu.memory_space<vmem>>, vector<8x80xf32>
    %c0_34 = arith.constant 0 : index
    %c0_35 = arith.constant 0 : index
    %43 = vector.load %arg4[%c0_34, %c0_35] : memref<80x512xf32, #tpu.memory_space<vmem>>, vector<80x512xf32>
    %cst_36 = arith.constant dense<0.000000e+00> : vector<8x512xf32>
    %44 = tpu.matmul %42, %43, %cst_36 {dimension_numbers = #tpu.dot_dimension_numbers<[1], [0], [0], [1], [0, 0, 1, 1], [], []>} : vector<8x80xf32>, vector<80x512xf32>, vector<8x512xf32> -> vector<8x512xf32>
    %c0_37 = arith.constant 0 : index
    %c0_38 = arith.constant 0 : index
    %45 = vector.load %arg3[%c0_37, %c0_38] : memref<8x512xf32, #tpu.memory_space<vmem>>, vector<8x512xf32>
    tpu.vector_store %arg3[%c0_37, %c0_38], %44 {strides = array<i32>} : memref<8x512xf32, #tpu.memory_space<vmem>>, vector<8x512xf32>,
    return
  }
  func.func @transform_0(%arg0: i32) -> (i32, i32, i32) {
    %c0_i32 = arith.constant 0 : i32
    %c0_i32_0 = arith.constant 0 : i32
    %c0_i32_1 = arith.constant 0 : i32
    %c0_i32_2 = arith.constant 0 : i32
    return %c0_i32, %c0_i32_0, %c0_i32_1 : i32, i32, i32
  }
  func.func @transform_1(%arg0: i32) -> (i32, i32) {
    %c0_i32 = arith.constant 0 : i32
    %c0_i32_0 = arith.constant 0 : i32
    %c0_i32_1 = arith.constant 0 : i32
    return %c0_i32, %c0_i32_0 : i32, i32
  }
  func.func @transform_2(%arg0: i32) -> (i32, i32) {
    %c0_i32 = arith.constant 0 : i32
    %c0_i32_0 = arith.constant 0 : i32
    %c0_i32_1 = arith.constant 0 : i32
    return %c0_i32, %c0_i32_0 : i32, i32
  }
}

</mosaic_0001>

<bundles_post_ra>
// kernel: _depthwise_separable_conv.1
= control target key start
LH: loop header
LB: loop body
LE: loop exit
PB: predicated region body
PF: predicated region fallthrough
CT: control target
= control target key end

     0   :  { %s602_s21 = smov 127   ;;  %s603_s22 = smov 126   ;;  %v609_v9 = vmov 0.0   ;;  %vm25_vm0 = vcmask 1039360   ;;  %vm38_vm1 = vcmask 1031168   ;;  %vm51_vm2 = vcmask 916480   ;;  %s700_s0 = inlined_call_operand.vmem [shape: f32[2,8,384], index: 0, kind: input, shape index: {}]   ;;  %s701_s1 = inlined_call_operand.vmem [shape: f32[8,80], index: 1, kind: input, shape index: {}]   ;;  %s702_s2 = inlined_call_operand.vmem [shape: f32[8,512], index: 2, kind: output, shape index: {}]  }
   0x1   :  { %v12_v0 = vld [vmem:[%s700_s0 + $0x8] sm:$0xff]  ;;  %v13_v1 = vld [vmem:[%s700_s0 + $0x10] sm:$0xff]  ;;  %v11_v2 = vld [vmem:[%s700_s0] sm:$0xff]  ;;  %s604_s23 = smov 112   ;;  %s605_s24 = smov 111   ;;  %341 = vmatprep.mubr.f32.mxu0 %v609_v9  ;;  %412 = vmatprep.mubr.f32.mxu1 %v609_v9  ;;  %vm64_vm3 = vcmask 908288  }
   0x2   :  { %v482_v3 = vpack.i.bf16 %v13_v1, %v12_v0  ;;  %v639_v4 = vld [vmem:[%s700_s0 + $0x18] sm:$0xff]  ;;  %v644_v5 = vld [vmem:[%s700_s0 + $0x20] sm:$0xff]  ;;  %v429_v6 = vld [vmem:[%s700_s0 + $0x28] sm:$0xff]  ;;  %s606_s25 = smov 110   ;;  %s607_s0 = smov 96   ;;  %vm77_vm4 = vcmask 900096  }
   0x3   :  { %v492_v7 = vpack.i.bf16 %v639_v4, %v11_v2  ;;  %v487_v8 = vpack.i.bf16 %v429_v6, %v644_v5  ;;  %s608_s26 = smov 95   ;;  %s610_s27 = smov 94   ;;  %vm90_vm5 = vcmask 785408   ;;  %vm103_vm6 = vcmask 777216  }
   0x4   :  { %483 = vrot.lane.b32.xlu0 %v482_v3, %s602_s21  ;;  %vm116_vm7 = vcmask 769024   ;;  %vm273_vm8 = vcmask 654336  }
   0x5   :  { %493 = vrot.lane.b32.xlu1 %v492_v7, %s602_s21 }
   0x8   :  { %488 = vrot.lane.b32.xlu0 %v487_v8, %s602_s21 }
   0x9   :  { %498 = vrot.lane.b32.xlu1 %v482_v3, %s603_s22 }
   0xc   :  { %503 = vrot.lane.b32.xlu0 %v482_v3, %s604_s23 }
   0xd   :  { %508 = vrot.lane.b32.xlu1 %v487_v8, %s603_s22 }
  0x10   :  { %513 = vrot.lane.b32.xlu0 %v487_v8, %s604_s23 }
  0x11   :  { %518 = vrot.lane.b32.xlu1 %v492_v7, %s603_s22 }
  0x14   :  { %523 = vrot.lane.b32.xlu0 %v492_v7, %s604_s23 }
  0x15   :  { %528 = vrot.lane.b32.xlu1 %v482_v3, %s605_s24 }
  0x18   :  { %533 = vrot.lane.b32.xlu0 %v482_v3, %s606_s25 }
  0x19   :  { %538 = vrot.lane.b32.xlu1 %v487_v8, %s605_s24 }
  0x1c   :  { %543 = vrot.lane.b32.xlu0 %v487_v8, %s606_s25 }
  0x1d   :  { %548 = vrot.lane.b32.xlu1 %v492_v7, %s605_s24 }
  0x20   :  { %553 = vrot.lane.b32.xlu0 %v492_v7, %s606_s25 }
  0x21   :  { %558 = vrot.lane.b32.xlu1 %v482_v3, %s607_s0 }
  0x24   :  { %563 = vrot.lane.b32.xlu0 %v482_v3, %s608_s26 }
  0x25   :  { %568 = vrot.lane.b32.xlu1 %v487_v8, %s607_s0 }
  0x28   :  { %573 = vrot.lane.b32.xlu0 %v487_v8, %s608_s26 }
  0x29   :  { %578 = vrot.lane.b32.xlu1 %v492_v7, %s607_s0 }
  0x2c   :  { %583 = vrot.lane.b32.xlu0 %v492_v7, %s608_s26 }
  0x2d   :  { %588 = vrot.lane.b32.xlu1 %v482_v3, %s610_s27 }
  0x30   :  { %593 = vrot.lane.b32.xlu0 %v487_v8, %s610_s27 }
  0x31   :  { %598 = vrot.lane.b32.xlu1 %v492_v7, %s610_s27 }
  0x76   :  { %v484_v10 = vpop.permute.xlu0 %483 }
  0x77   :  { %v486_v11 = vunpack.i.h.bf16 %v484_v10  ;;  %v485_v12 = vunpack.i.l.bf16 %v484_v10  ;;  %v494_v13 = vpop.permute.xlu1 %493 }
  0x78   :  { %v495_v14 = vunpack.i.l.bf16 %v494_v13  ;;  %v496_v19 = vunpack.i.h.bf16 %v494_v13 }
  0x79   :  { %v27_v15 = vsel %vm25_vm0, %v485_v12, %v486_v11 }
  0x7a   :  { %v489_v16 = vpop.permute.xlu0 %488  ;;  %v432_v17 = vpack.c.bf16 %v27_v15, %v12_v0  ;;  %v26_v18 = vsel %vm25_vm0, %v495_v14, %v485_v12 }
  0x7b   :  { %v491_v20 = vunpack.i.h.bf16 %v489_v16  ;;  %v490_v21 = vunpack.i.l.bf16 %v489_v16  ;;  %v499_v22 = vpop.permute.xlu1 %498  ;;  %v434_v23 = vpack.c.bf16 %v26_v18, %v11_v2 }
  0x7c   :  { %433 = vmatprep.subr.bf16.mxu0 %v432_v17  ;;  %v501_v24 = vunpack.i.h.bf16 %v499_v22  ;;  %v500_v25 = vunpack.i.l.bf16 %v499_v22 }
  0x7d   :  { %435 = vmatpush1.bf16.msra.mxu0 %v434_v23  ;;  %v139_v26 = vsel %vm25_vm0, %v490_v21, %v491_v20  ;;  %v138_v27 = vsel %vm25_vm0, %v496_v19, %v490_v21 }
  0x7e   :  { %v504_v28 = vpop.permute.xlu0 %503  ;;  %v452_v29 = vpack.c.bf16 %v139_v26, %v644_v5  ;;  %v454_v30 = vpack.c.bf16 %v138_v27, %v639_v4  ;;  %v40_v36 = vsel %vm38_vm1, %v500_v25, %v501_v24 }
  0x7f   :  { %v506_v31 = vunpack.i.h.bf16 %v504_v28  ;;  %v505_v32 = vunpack.i.l.bf16 %v504_v28  ;;  %v509_v33 = vpop.permute.xlu1 %508 }
  0x80   :  { %453 = vmatprep.subr.bf16.mxu1 %v452_v29  ;;  %v511_v34 = vunpack.i.h.bf16 %v509_v33  ;;  %v510_v35 = vunpack.i.l.bf16 %v509_v33 }
  0x81   :  { %455 = vmatpush1.bf16.msra.mxu1 %v454_v30  ;;  %v53_v37 = vsel %vm51_vm2, %v505_v32, %v506_v31 }
  0x82   :  { %v514_v38 = vpop.permute.xlu0 %513  ;;  %v436_v39 = vpack.c.bf16 %v53_v37, %v40_v36  ;;  %v151_v45 = vsel %vm38_vm1, %v510_v35, %v511_v34 }
  0x83   :  { %v516_v40 = vunpack.i.h.bf16 %v514_v38  ;;  %v515_v41 = vunpack.i.l.bf16 %v514_v38  ;;  %v519_v42 = vpop.permute.xlu1 %518 }
  0x84   :  { %v521_v43 = vunpack.i.h.bf16 %v519_v42  ;;  %v520_v44 = vunpack.i.l.bf16 %v519_v42  ;;  %437 = vmatprep.subr.bf16.mxu0 %v436_v39 }
  0x85   :  { %v163_v46 = vsel %vm51_vm2, %v515_v41, %v516_v40 }
  0x86   :  { %v524_v47 = vpop.permute.xlu0 %523  ;;  %v456_v48 = vpack.c.bf16 %v163_v46, %v151_v45  ;;  %v39_v52 = vsel %vm38_vm1, %v520_v44, %v500_v25  ;;  %v150_v53 = vsel %vm38_vm1, %v521_v43, %v510_v35 }
  0x87   :  { %v526_v49 = vunpack.i.h.bf16 %v524_v47  ;;  %v525_v50 = vunpack.i.l.bf16 %v524_v47  ;;  %v529_v51 = vpop.permute.xlu1 %528 }
  0x88   :  { %457 = vmatprep.subr.bf16.mxu1 %v456_v48  ;;  %v531_v54 = vunpack.i.h.bf16 %v529_v51  ;;  %v530_v55 = vunpack.i.l.bf16 %v529_v51 }
  0x89   :  { %v52_v56 = vsel %vm51_vm2, %v525_v50, %v505_v32  ;;  %v162_v57 = vsel %vm51_vm2, %v526_v49, %v515_v41 }
  0x8a   :  { %v534_v58 = vpop.permute.xlu0 %533  ;;  %v438_v59 = vpack.c.bf16 %v52_v56, %v39_v52  ;;  %v458_v60 = vpack.c.bf16 %v162_v57, %v150_v53  ;;  %v66_v2 = vsel %vm64_vm3, %v530_v55, %v531_v54 }
  0x8b   :  { %v536_v61 = vunpack.i.h.bf16 %v534_v58  ;;  %v535_v62 = vunpack.i.l.bf16 %v534_v58  ;;  %v539_v63 = vpop.permute.xlu1 %538 }
  0x8c   :  { %439 = vmatpush1.bf16.msra.mxu0 %v438_v59  ;;  %459 = vmatpush1.bf16.msra.mxu1 %v458_v60  ;;  %v541_v0 = vunpack.i.h.bf16 %v539_v63  ;;  %v540_v1 = vunpack.i.l.bf16 %v539_v63 }
  0x8d   :  { %v79_v3 = vsel %vm77_vm4, %v535_v62, %v536_v61  ;;  %v611_v61 = vmov 1.0  }
  0x8e   :  { %v544_v4 = vpop.permute.xlu0 %543  ;;  %v440_v5 = vpack.c.bf16 %v79_v3, %v66_v2  ;;  %v175_v11 = vsel %vm64_vm3, %v540_v1, %v541_v0 }
  0x8f   :  { %v546_v6 = vunpack.i.h.bf16 %v544_v4  ;;  %v545_v7 = vunpack.i.l.bf16 %v544_v4  ;;  %v549_v8 = vpop.permute.xlu1 %548 }
  0x90   :  { %v551_v9 = vunpack.i.h.bf16 %v549_v8  ;;  %v550_v10 = vunpack.i.l.bf16 %v549_v8  ;;  %441 = vmatprep.subr.bf16.mxu0 %v440_v5 }
  0x91   :  { %v187_v12 = vsel %vm77_vm4, %v545_v7, %v546_v6 }
  0x92   :  { %v554_v13 = vpop.permute.xlu0 %553  ;;  %v460_v14 = vpack.c.bf16 %v187_v12, %v175_v11  ;;  %v65_v18 = vsel %vm64_vm3, %v550_v10, %v530_v55  ;;  %v174_v19 = vsel %vm64_vm3, %v551_v9, %v540_v1 }
  0x93   :  { %v556_v15 = vunpack.i.h.bf16 %v554_v13  ;;  %v555_v16 = vunpack.i.l.bf16 %v554_v13  ;;  %v559_v17 = vpop.permute.xlu1 %558 }
  0x94   :  { %461 = vmatprep.subr.bf16.mxu1 %v460_v14  ;;  %v561_v20 = vunpack.i.h.bf16 %v559_v17  ;;  %v560_v21 = vunpack.i.l.bf16 %v559_v17 }
  0x95   :  { %v78_v22 = vsel %vm77_vm4, %v555_v16, %v535_v62  ;;  %v186_v23 = vsel %vm77_vm4, %v556_v15, %v545_v7  ;;  %v232_v7 = vld [vmem:[%s701_s1] sm:$0xff] }
  0x96   :  { %v564_v24 = vpop.permute.xlu0 %563  ;;  %v442_v25 = vpack.c.bf16 %v78_v22, %v65_v18  ;;  %v462_v26 = vpack.c.bf16 %v186_v23, %v174_v19  ;;  %v92_v32 = vsel %vm90_vm5, %v560_v21, %v561_v20 }
  0x97   :  { %v566_v27 = vunpack.i.h.bf16 %v564_v24  ;;  %v565_v28 = vunpack.i.l.bf16 %v564_v24  ;;  %v569_v29 = vpop.permute.xlu1 %568 }
  0x98   :  { %443 = vmatpush1.bf16.msra.mxu0 %v442_v25  ;;  %463 = vmatpush1.bf16.msra.mxu1 %v462_v26  ;;  %v571_v30 = vunpack.i.h.bf16 %v569_v29  ;;  %v570_v31 = vunpack.i.l.bf16 %v569_v29 }
  0x99   :  { %v105_v33 = vsel %vm103_vm6, %v565_v28, %v566_v27 }
  0x9a   :  { %v574_v34 = vpop.permute.xlu0 %573  ;;  %v444_v35 = vpack.c.bf16 %v105_v33, %v92_v32  ;;  %v199_v41 = vsel %vm90_vm5, %v570_v31, %v571_v30 }
  0x9b   :  { %v576_v36 = vunpack.i.h.bf16 %v574_v34  ;;  %v575_v37 = vunpack.i.l.bf16 %v574_v34  ;;  %v579_v38 = vpop.permute.xlu1 %578 }
  0x9c   :  { %445 = vmatprep.subr.bf16.mxu0 %v444_v35  ;;  %v581_v39 = vunpack.i.h.bf16 %v579_v38  ;;  %v580_v40 = vunpack.i.l.bf16 %v579_v38 }
  0x9d   :  { %v211_v42 = vsel %vm103_vm6, %v575_v37, %v576_v36 }
  0x9e   :  { %v584_v43 = vpop.permute.xlu0 %583  ;;  %v464_v44 = vpack.c.bf16 %v211_v42, %v199_v41  ;;  %v91_v50 = vsel %vm90_vm5, %v580_v40, %v560_v21  ;;  %v198_v52 = vsel %vm90_vm5, %v581_v39, %v570_v31 }
  0x9f   :  { %v586_v45 = vunpack.i.h.bf16 %v584_v43  ;;  %v585_v46 = vunpack.i.l.bf16 %v584_v43  ;;  %v589_v47 = vpop.permute.xlu1 %588 }
  0xa0   :  { %v591_v48 = vunpack.i.h.bf16 %v589_v47  ;;  %v590_v49 = vunpack.i.l.bf16 %v589_v47  ;;  %465 = vmatprep.subr.bf16.mxu1 %v464_v44 }
  0xa1   :  { %v104_v51 = vsel %vm103_vm6, %v585_v46, %v565_v28  ;;  %v210_v53 = vsel %vm103_vm6, %v586_v45, %v575_v37 }
  0xa2   :  { %v594_v54 = vpop.permute.xlu0 %593  ;;  %v446_v55 = vpack.c.bf16 %v104_v51, %v91_v50  ;;  %v466_v56 = vpack.c.bf16 %v210_v53, %v198_v52  ;;  %v118_v57 = vsel %vm116_vm7, %v590_v49, %v591_v48 }
  0xa3   :  { %v596_v58 = vunpack.i.h.bf16 %v594_v54  ;;  %v595_v59 = vunpack.i.l.bf16 %v594_v54  ;;  %v599_v60 = vpop.permute.xlu1 %598  ;;  %v448_v62 = vpack.c.bf16 %v611_v61, %v118_v57 }
  0xa4   :  { %v601_v63 = vunpack.i.h.bf16 %v599_v60  ;;  %v600_v0 = vunpack.i.l.bf16 %v599_v60  ;;  %447 = vmatpush1.bf16.msra.mxu0 %v446_v55  ;;  %467 = vmatpush1.bf16.msra.mxu1 %v466_v56 }
  0xa5   :  { %449 = vmatprep.subr.bf16.mxu0 %v448_v62  ;;  %v223_v1 = vsel %vm116_vm7, %v595_v59, %v596_v58 }
  0xa6   :  { %v117_v2 = vsel %vm116_vm7, %v600_v0, %v590_v49  ;;  %v468_v3 = vpack.c.bf16 %v611_v61, %v223_v1  ;;  %v222_v4 = vsel %vm116_vm7, %v601_v63, %v595_v59 }
  0xa7   :  { %v450_v5 = vpack.c.bf16 %v611_v61, %v117_v2  ;;  %v470_v6 = vpack.c.bf16 %v611_v61, %v222_v4 }
  0xa8   :  { %469 = vmatprep.subr.bf16.mxu1 %v468_v3 }
  0xa9   :  { %451 = vmatpush1.bf16.msra.mxu0 %v450_v5  ;;  %471 = vmatpush1.bf16.msra.mxu1 %v470_v6 }
  0xac   :  { %430 = vmatmul.mubr.msk.f32.vlgmr.msra.gmra.mrb[0].mxu0 %vm273_vm8, %v232_v7  ;;  %431 = vmatmul.mubr.msk.f32.vlgmr.msra.gmra.mrb[0].mxu1 %vm273_vm8, %v232_v7 }
 0x17f   :  { %v343_v8 = vpop.f32.mrb[0].mxu0  ;;  %v414_v9 = vpop.f32.mrb[0].mxu1 }
 0x180   :  { %419 = vst [vmem:[%s702_s2] sm:$0xff] %v343_v8  ;;  %v345_v10 = vpop.f32.mrb[1].mxu0  ;;  %421 = vst [vmem:[%s702_s2 + $0x10] sm:$0xff] %v414_v9  ;;  %v416_v11 = vpop.f32.mrb[1].mxu1 }
 0x181   :  { %420 = vst [vmem:[%s702_s2 + $0x8] sm:$0xff] %v345_v10  ;;  %422 = vst [vmem:[%s702_s2 + $0x18] sm:$0xff] %v416_v11 }

</bundles_post_ra>
